<compile_context>
chip_gen: v6e
topology: v6e:2x2x1
jax: 0.10.0
libtpu: 0.0.40
codegen_flags: <defaults>
</compile_context>

<pallas_src>
import jax
import jax.numpy as jnp
from jax import lax
from jax.experimental import pallas as pl
from jax.experimental.pallas import tpu as pltpu

LANE = 128


def _round_up(x, m):
    return ((x + m - 1) // m) * m


def cbow_kernel(ids_ref, emb_ref, w1_ref, b1_ref, w2_ref, b2_ref, out_ref):
    # ids_ref : VMEM [TB, L]  int32   token ids for this batch tile (padded rows are 0)
    # emb_ref : VMEM [Vp, Ep] f32     zero-padded embedding table (resident, constant index_map)
    # w1_ref  : VMEM [Ep, Hp] f32     b1_ref: [1, Hp]
    # w2_ref  : VMEM [Hp, Cp] f32     b2_ref: [1, Cp]
    # out_ref : VMEM [TB, Cp] f32
    tb, seq_len = ids_ref.shape
    vp = emb_ref.shape[0]

    ids = ids_ref[...]                                          # [TB, L] int32
    vocab_iota = lax.broadcasted_iota(jnp.int32, (tb, vp), 1)   # lane index per column

    # Bag-of-words counts: sum of one-hots over the (small, static) sequence length.
    counts = jnp.zeros((tb, vp), jnp.float32)
    for l in range(seq_len):                                    # static unroll; L is small for CBOW
        tok = ids[:, l:l + 1]                                    # [TB, 1]
        counts = counts + (vocab_iota == tok).astype(jnp.float32)

    # Gather + mean-pool as one MXU matmul: pooled = (counts @ table) / L.
    inv_l = jnp.float32(1.0 / seq_len)
    pooled = jnp.dot(counts, emb_ref[...], preferred_element_type=jnp.float32) * inv_l

    # Dropout: identity in eval mode.
    # Linear -> ReLU -> Linear (MXU, f32 accumulate).
    h = jnp.dot(pooled, w1_ref[...], preferred_element_type=jnp.float32)
    h = jnp.maximum(h + b1_ref[...], 0.0)
    out_ref[...] = (jnp.dot(h, w2_ref[...], preferred_element_type=jnp.float32)
                    + b2_ref[...]).astype(out_ref.dtype)


def cbow_forward(x_ids, emb_table, w1, b1, w2, b2, *, tb=None):
    B, L = x_ids.shape
    V, E = emb_table.shape
    H = w1.shape[1]
    C = w2.shape[1]

    # Lane-dense padding (MXU-friendly contracting dims, unmasked output stores).
    Vp = _round_up(V, LANE)
    Ep = _round_up(E, LANE)
    Hp = _round_up(H, LANE)
    Cp = _round_up(C, LANE)

    # VMEM-resident counts-matmul path only (see TODOs above for huge vocabularies).
    assert Vp * Ep * 4 <= 24 * (1 << 20), "embedding table too large for VMEM-resident path"

    # Batch tile: multiple of 8; aim for >= 4 grid steps at large B (v7x megacore),
    # cap so the [TB, Vp] counts intermediate stays small.
    if tb is None:
        tb = max(8, min(256, _round_up(-(-B // 4), 8)))
    tb = max(8, (tb // 8) * 8)
    tb = min(tb, max(8, (((4 << 20) // (Vp * 4)) // 8) * 8))
    B_pad = pl.cdiv(B, tb) * tb

    # Zero-padded inputs / parameters (padded rows/cols contribute nothing, sliced off at the end).
    ids_p = jnp.zeros((B_pad, L), jnp.int32).at[:B].set(x_ids.astype(jnp.int32))
    emb_p = jnp.zeros((Vp, Ep), jnp.float32).at[:V, :E].set(emb_table.astype(jnp.float32))
    w1_p = jnp.zeros((Ep, Hp), jnp.float32).at[:E, :H].set(w1)
    b1_p = jnp.zeros((1, Hp), jnp.float32).at[:, :H].set(jnp.reshape(b1, (1, H)))
    w2_p = jnp.zeros((Hp, Cp), jnp.float32).at[:H, :C].set(w2)
    b2_p = jnp.zeros((1, Cp), jnp.float32).at[:, :C].set(jnp.reshape(b2, (1, C)))

    grid = (B_pad // tb,)

    # Explicit VMEM budget (double-buffered blocks + intermediates), clamped to fit every chip.
    est_vmem = 4 * (2 * tb * max(L, LANE)
                    + 2 * (Vp * Ep + Ep * Hp + 8 * Hp + Hp * Cp + 8 * Cp)
                    + 2 * tb * Cp
                    + tb * (Vp + Ep + Hp + Cp))
    vmem_limit = int(min(max(2 * est_vmem, 32 << 20), 64 << 20))

    cost = pl.CostEstimate(
        flops=2 * B_pad * (Vp * Ep + Ep * Hp + Hp * Cp),
        transcendentals=0,
        bytes_accessed=4 * (B_pad * L + Vp * Ep + Ep * Hp + Hp * Cp + Hp + Cp + B_pad * Cp),
    )

    out = pl.pallas_call(
        cbow_kernel,
        out_shape=jax.ShapeDtypeStruct((B_pad, Cp), jnp.float32),
        grid_spec=pltpu.PrefetchScalarGridSpec(
            num_scalar_prefetch=0,
            grid=grid,
            in_specs=[
                pl.BlockSpec((tb, L), lambda i: (i, 0)),        # token ids for this tile
                pl.BlockSpec((Vp, Ep), lambda i: (0, 0)),       # embedding table (resident)
                pl.BlockSpec((Ep, Hp), lambda i: (0, 0)),       # weights resident across steps
                pl.BlockSpec((1, Hp), lambda i: (0, 0)),
                pl.BlockSpec((Hp, Cp), lambda i: (0, 0)),
                pl.BlockSpec((1, Cp), lambda i: (0, 0)),
            ],
            out_specs=pl.BlockSpec((tb, Cp), lambda i: (i, 0)),
        ),
        compiler_params=pltpu.CompilerParams(
            dimension_semantics=("parallel",),                  # 2 TCs on v7x; no-op on v5e/v6e
            vmem_limit_bytes=vmem_limit,
        ),
        cost_estimate=cost,
    )(ids_p, emb_p, w1_p, b1_p, w2_p, b2_p)

    return out[:B, :C]


def make_params(key, vocab_size, embedding_dim, hidden_dim, n_classes):
    k_emb, k_w1, k_b1, k_w2, k_b2 = jax.random.split(key, 5)
    # nn.Embedding default: N(0, 1)
    emb_table = jax.random.normal(k_emb, (vocab_size, embedding_dim), jnp.float32)
    # nn.Linear default: U(-1/sqrt(fan_in), 1/sqrt(fan_in))
    lim1 = 1.0 / jnp.sqrt(embedding_dim)
    w1 = jax.random.uniform(k_w1, (embedding_dim, hidden_dim), jnp.float32, -lim1, lim1)
    b1 = jax.random.uniform(k_b1, (1, hidden_dim), jnp.float32, -lim1, lim1)
    lim2 = 1.0 / jnp.sqrt(hidden_dim)
    w2 = jax.random.uniform(k_w2, (hidden_dim, n_classes), jnp.float32, -lim2, lim2)
    b2 = jax.random.uniform(k_b2, (1, n_classes), jnp.float32, -lim2, lim2)
    return emb_table, w1, b1, w2, b2


if __name__ == "__main__":
    B, L = 8, 8                 # batch, sequence length
    vocab_size = 32
    embedding_dim = 32
    hidden_dim = 32
    n_classes = 4

    key = jax.random.PRNGKey(0)
    k_x, k_p = jax.random.split(key)
    x_ids = jax.random.randint(k_x, (B, L), 0, vocab_size, jnp.int32)
    emb_table, w1, b1, w2, b2 = make_params(
        k_p, vocab_size, embedding_dim, hidden_dim, n_classes)

    out = cbow_forward(x_ids, emb_table, w1, b1, w2, b2)
    jax.block_until_ready(out)

    # Pure-JAX reference (same semantics as the PyTorch forward in eval mode).
    ref = jnp.take(emb_table, x_ids, axis=0).mean(axis=1)
    ref = jnp.maximum(ref @ w1 + b1, 0.0) @ w2 + b2
    assert out.shape == (B, n_classes)
    assert jnp.allclose(out, ref, atol=1e-4, rtol=1e-4), (out, ref)

    print("KERNEL_OK")
</pallas_src>

<mosaic_0001>
module attributes {stable_mosaic.version = 11 : i64} {
  func.func @cbow_kernel(%arg0: i32, %arg1: memref<8x8xi32, #tpu.memory_space<vmem>>, %arg2: memref<128x128xf32, #tpu.memory_space<vmem>>, %arg3: memref<128x128xf32, #tpu.memory_space<vmem>>, %arg4: memref<1x128xf32, #tpu.memory_space<vmem>>, %arg5: memref<128x128xf32, #tpu.memory_space<vmem>>, %arg6: memref<1x128xf32, #tpu.memory_space<vmem>>, %arg7: memref<8x128xf32, #tpu.memory_space<vmem>>) attributes {dimension_semantics = [#tpu.dimension_semantics<parallel>], iteration_bounds = array<i64: 1>, scalar_prefetch = 0 : i64, scratch_operands = 0 : i64, tpu.core_type = #tpu.core_type<tc>, window_params = [{transform_indices = @transform_0, window_bounds = array<i64: 8, 8>}, {pipeline_mode = #tpu.pipeline_mode<synchronous>, transform_indices = @transform_1, window_bounds = array<i64: 128, 128>}, {pipeline_mode = #tpu.pipeline_mode<synchronous>, transform_indices = @transform_2, window_bounds = array<i64: 128, 128>}, {pipeline_mode = #tpu.pipeline_mode<synchronous>, transform_indices = @transform_3, window_bounds = array<i64: 1, 128>}, {pipeline_mode = #tpu.pipeline_mode<synchronous>, transform_indices = @transform_4, window_bounds = array<i64: 128, 128>}, {pipeline_mode = #tpu.pipeline_mode<synchronous>, transform_indices = @transform_5, window_bounds = array<i64: 1, 128>}, {transform_indices = @transform_6, window_bounds = array<i64: 8, 128>}]} {
    %c0 = arith.constant 0 : index
    %c0_0 = arith.constant 0 : index
    %0 = vector.load %arg1[%c0, %c0_0] : memref<8x8xi32, #tpu.memory_space<vmem>>, vector<8x8xi32>
    %1 = tpu.iota {dimensions = array<i32: 1>} : vector<8x128xi32>
    %cst = arith.constant 0.000000e+00 : f32
    %2 = vector.broadcast %cst : f32 to vector<8x128xf32>
    %3 = vector.extract_strided_slice %0 {offsets = [0, 0], sizes = [8, 1], strides = [1, 1]} : vector<8x8xi32> to vector<8x1xi32>
    %4 = vector.broadcast %3 : vector<8x1xi32> to vector<8x128xi32>
    %5 = arith.cmpi eq, %1, %4 : vector<8x128xi32>
    %6 = arith.extui %5 : vector<8x128xi1> to vector<8x128xi32>
    %7 = arith.sitofp %6 : vector<8x128xi32> to vector<8x128xf32>
    %8 = arith.addf %2, %7 : vector<8x128xf32>
    %9 = vector.extract_strided_slice %0 {offsets = [0, 1], sizes = [8, 1], strides = [1, 1]} : vector<8x8xi32> to vector<8x1xi32>
    %10 = vector.broadcast %9 : vector<8x1xi32> to vector<8x128xi32>
    %11 = arith.cmpi eq, %1, %10 : vector<8x128xi32>
    %12 = arith.extui %11 : vector<8x128xi1> to vector<8x128xi32>
    %13 = arith.sitofp %12 : vector<8x128xi32> to vector<8x128xf32>
    %14 = arith.addf %8, %13 : vector<8x128xf32>
    %15 = vector.extract_strided_slice %0 {offsets = [0, 2], sizes = [8, 1], strides = [1, 1]} : vector<8x8xi32> to vector<8x1xi32>
    %16 = vector.broadcast %15 : vector<8x1xi32> to vector<8x128xi32>
    %17 = arith.cmpi eq, %1, %16 : vector<8x128xi32>
    %18 = arith.extui %17 : vector<8x128xi1> to vector<8x128xi32>
    %19 = arith.sitofp %18 : vector<8x128xi32> to vector<8x128xf32>
    %20 = arith.addf %14, %19 : vector<8x128xf32>
    %21 = vector.extract_strided_slice %0 {offsets = [0, 3], sizes = [8, 1], strides = [1, 1]} : vector<8x8xi32> to vector<8x1xi32>
    %22 = vector.broadcast %21 : vector<8x1xi32> to vector<8x128xi32>
    %23 = arith.cmpi eq, %1, %22 : vector<8x128xi32>
    %24 = arith.extui %23 : vector<8x128xi1> to vector<8x128xi32>
    %25 = arith.sitofp %24 : vector<8x128xi32> to vector<8x128xf32>
    %26 = arith.addf %20, %25 : vector<8x128xf32>
    %27 = vector.extract_strided_slice %0 {offsets = [0, 4], sizes = [8, 1], strides = [1, 1]} : vector<8x8xi32> to vector<8x1xi32>
    %28 = vector.broadcast %27 : vector<8x1xi32> to vector<8x128xi32>
    %29 = arith.cmpi eq, %1, %28 : vector<8x128xi32>
    %30 = arith.extui %29 : vector<8x128xi1> to vector<8x128xi32>
    %31 = arith.sitofp %30 : vector<8x128xi32> to vector<8x128xf32>
    %32 = arith.addf %26, %31 : vector<8x128xf32>
    %33 = vector.extract_strided_slice %0 {offsets = [0, 5], sizes = [8, 1], strides = [1, 1]} : vector<8x8xi32> to vector<8x1xi32>
    %34 = vector.broadcast %33 : vector<8x1xi32> to vector<8x128xi32>
    %35 = arith.cmpi eq, %1, %34 : vector<8x128xi32>
    %36 = arith.extui %35 : vector<8x128xi1> to vector<8x128xi32>
    %37 = arith.sitofp %36 : vector<8x128xi32> to vector<8x128xf32>
    %38 = arith.addf %32, %37 : vector<8x128xf32>
    %39 = vector.extract_strided_slice %0 {offsets = [0, 6], sizes = [8, 1], strides = [1, 1]} : vector<8x8xi32> to vector<8x1xi32>
    %40 = vector.broadcast %39 : vector<8x1xi32> to vector<8x128xi32>
    %41 = arith.cmpi eq, %1, %40 : vector<8x128xi32>
    %42 = arith.extui %41 : vector<8x128xi1> to vector<8x128xi32>
    %43 = arith.sitofp %42 : vector<8x128xi32> to vector<8x128xf32>
    %44 = arith.addf %38, %43 : vector<8x128xf32>
    %45 = vector.extract_strided_slice %0 {offsets = [0, 7], sizes = [8, 1], strides = [1, 1]} : vector<8x8xi32> to vector<8x1xi32>
    %46 = vector.broadcast %45 : vector<8x1xi32> to vector<8x128xi32>
    %47 = arith.cmpi eq, %1, %46 : vector<8x128xi32>
    %48 = arith.extui %47 : vector<8x128xi1> to vector<8x128xi32>
    %49 = arith.sitofp %48 : vector<8x128xi32> to vector<8x128xf32>
    %50 = arith.addf %44, %49 : vector<8x128xf32>
    %c0_1 = arith.constant 0 : index
    %c0_2 = arith.constant 0 : index
    %51 = vector.load %arg2[%c0_1, %c0_2] : memref<128x128xf32, #tpu.memory_space<vmem>>, vector<128x128xf32>
    %cst_3 = arith.constant dense<0.000000e+00> : vector<8x128xf32>
    %52 = tpu.matmul %50, %51, %cst_3 {dimension_numbers = #tpu.dot_dimension_numbers<[1], [0], [0], [1], [0, 0, 1, 1], [], []>} : vector<8x128xf32>, vector<128x128xf32>, vector<8x128xf32> -> vector<8x128xf32>
    %cst_4 = arith.constant 1.250000e-01 : f32
    %53 = vector.broadcast %cst_4 : f32 to vector<8x128xf32>
    %54 = arith.mulf %52, %53 : vector<8x128xf32>
    %c0_5 = arith.constant 0 : index
    %c0_6 = arith.constant 0 : index
    %55 = vector.load %arg3[%c0_5, %c0_6] : memref<128x128xf32, #tpu.memory_space<vmem>>, vector<128x128xf32>
    %cst_7 = arith.constant dense<0.000000e+00> : vector<8x128xf32>
    %56 = tpu.matmul %54, %55, %cst_7 {dimension_numbers = #tpu.dot_dimension_numbers<[1], [0], [0], [1], [0, 0, 1, 1], [], []>} : vector<8x128xf32>, vector<128x128xf32>, vector<8x128xf32> -> vector<8x128xf32>
    %c0_8 = arith.constant 0 : index
    %c0_9 = arith.constant 0 : index
    %57 = vector.load %arg4[%c0_8, %c0_9] : memref<1x128xf32, #tpu.memory_space<vmem>>, vector<1x128xf32>
    %58 = vector.broadcast %57 : vector<1x128xf32> to vector<8x128xf32>
    %59 = arith.addf %56, %58 : vector<8x128xf32>
    %cst_10 = arith.constant 0.000000e+00 : f32
    %60 = vector.broadcast %cst_10 : f32 to vector<8x128xf32>
    %61 = arith.maximumf %59, %60 : vector<8x128xf32>
    %c0_11 = arith.constant 0 : index
    %c0_12 = arith.constant 0 : index
    %62 = vector.load %arg5[%c0_11, %c0_12] : memref<128x128xf32, #tpu.memory_space<vmem>>, vector<128x128xf32>
    %cst_13 = arith.constant dense<0.000000e+00> : vector<8x128xf32>
    %63 = tpu.matmul %61, %62, %cst_13 {dimension_numbers = #tpu.dot_dimension_numbers<[1], [0], [0], [1], [0, 0, 1, 1], [], []>} : vector<8x128xf32>, vector<128x128xf32>, vector<8x128xf32> -> vector<8x128xf32>
    %c0_14 = arith.constant 0 : index
    %c0_15 = arith.constant 0 : index
    %64 = vector.load %arg6[%c0_14, %c0_15] : memref<1x128xf32, #tpu.memory_space<vmem>>, vector<1x128xf32>
    %65 = vector.broadcast %64 : vector<1x128xf32> to vector<8x128xf32>
    %66 = arith.addf %63, %65 : vector<8x128xf32>
    %c0_16 = arith.constant 0 : index
    %c0_17 = arith.constant 0 : index
    %67 = vector.load %arg7[%c0_16, %c0_17] : memref<8x128xf32, #tpu.memory_space<vmem>>, vector<8x128xf32>
    tpu.vector_store %arg7[%c0_16, %c0_17], %66 {strides = array<i32>} : memref<8x128xf32, #tpu.memory_space<vmem>>, vector<8x128xf32>,
    return
  }
  func.func @transform_0(%arg0: i32) -> (i32, i32) {
    %c0_i32 = arith.constant 0 : i32
    %c0_i32_0 = arith.constant 0 : i32
    return %arg0, %c0_i32 : i32, i32
  }
  func.func @transform_1(%arg0: i32) -> (i32, i32) {
    %c0_i32 = arith.constant 0 : i32
    %c0_i32_0 = arith.constant 0 : i32
    %c0_i32_1 = arith.constant 0 : i32
    return %c0_i32, %c0_i32_0 : i32, i32
  }
  func.func @transform_2(%arg0: i32) -> (i32, i32) {
    %c0_i32 = arith.constant 0 : i32
    %c0_i32_0 = arith.constant 0 : i32
    %c0_i32_1 = arith.constant 0 : i32
    return %c0_i32, %c0_i32_0 : i32, i32
  }
  func.func @transform_3(%arg0: i32) -> (i32, i32) {
    %c0_i32 = arith.constant 0 : i32
    %c0_i32_0 = arith.constant 0 : i32
    %c0_i32_1 = arith.constant 0 : i32
    return %c0_i32, %c0_i32_0 : i32, i32
  }
  func.func @transform_4(%arg0: i32) -> (i32, i32) {
    %c0_i32 = arith.constant 0 : i32
    %c0_i32_0 = arith.constant 0 : i32
    %c0_i32_1 = arith.constant 0 : i32
    return %c0_i32, %c0_i32_0 : i32, i32
  }
  func.func @transform_5(%arg0: i32) -> (i32, i32) {
    %c0_i32 = arith.constant 0 : i32
    %c0_i32_0 = arith.constant 0 : i32
    %c0_i32_1 = arith.constant 0 : i32
    return %c0_i32, %c0_i32_0 : i32, i32
  }
  func.func @transform_6(%arg0: i32) -> (i32, i32) {
    %c0_i32 = arith.constant 0 : i32
    %c0_i32_0 = arith.constant 0 : i32
    return %arg0, %c0_i32 : i32, i32
  }
}

</mosaic_0001>

<bundles_post_ra>
// kernel: tpu_custom_call.1
= control target key start
LH: loop header
LB: loop body
LE: loop exit
PB: predicated region body
PF: predicated region fallthrough
CT: control target
= control target key end

     0   :  { %11 = vsyncpa [#allocation3], 0  ;;  %s872_s0 = inlined_call_operand.hbm [shape: s32[8,8], index: 0, kind: input, shape index: {}]   ;;  %s873_s1 = inlined_call_operand.hbm [shape: f32[128,128], index: 1, kind: input, shape index: {}]   ;;  %s874_s2 = inlined_call_operand.hbm [shape: f32[128,128], index: 2, kind: input, shape index: {}]   ;;  %s875_s3 = inlined_call_operand.vmem [shape: f32[1,128], index: 3, kind: input, shape index: {}]   ;;  %s876_s4 = inlined_call_operand.hbm [shape: f32[128,128], index: 4, kind: input, shape index: {}]   ;;  %s877_s5 = inlined_call_operand.vmem [shape: f32[1,128], index: 5, kind: input, shape index: {}]   ;;  %s878_s6 = inlined_call_operand.hbm [shape: f32[8,128], index: 6, kind: output, shape index: {}]  }
   0x1   :  { %12 = vsyncpa [#allocation6], 0 }
   0x2   :  { %13 = vsyncpa [#allocation9], 0 }
   0x3   :  { %14 = vsyncpa [#allocation4], 0  ;;  %s728_s21 = smov [#allocation5]  }
   0x4   :  { %s30_s22 = sshll.u32 %s728_s21, 4  ;;  %s31_s22 = int_to_ptr.vmem [resolvable:$true] %s30_s22 }
   0x5   :  { %s628_s23 = scalar_lea.vmem %s31_s22, 2048  ;;  %p633_p1 = scmp.lt.s32.totalorder %s31_s22, %s31_s22 }
   0x6   :  { %p629_p0 = scmp.ne.s32.totalorder %s31_s22, %s628_s23  ;;  %p634_p2 = scmp.lt.s32.totalorder %s628_s23, %s628_s23 }
   0x8   :  { %p635_p3 = por %p634_p2, %p633_p1 }
   0xa   :  { %p636_p4 = pnand %p635_p3, %p629_p0 }
   0xc   :  { %639 = shalt.err (!%p636_p4)
}
   0xd   :  { %s729_s24 = smov 128   ;;  %s730_s25 = smov 8  }
   0xe   :  { %36 = dma.hbm_to_vmem [thread:$0]  %s873_s1, 2048, %s31_s22, [#allocation6], %s729_s24, %s729_s24, %s730_s25  }
   0xf   :  { %s731_s28 = smov [#allocation2]   ;;  %s732_s30 = smov [#allocation7]  }
  0x10   :  { %s21_s29 = sshll.u32 %s731_s28, 4  ;;  %s42_s7 = sshll.u32 %s732_s30, 4  ;;  %s22_s29 = int_to_ptr.vmem [resolvable:$true] %s21_s29  ;;  %s43_s7 = int_to_ptr.vmem [resolvable:$true] %s42_s7 }
  0x11   :  { %s648_s8 = scalar_lea.vmem %s22_s29, 128  ;;  %p653_p6 = scmp.lt.s32.totalorder %s22_s29, %s22_s29 }
  0x12   :  { %p649_p5 = scmp.ne.s32.totalorder %s22_s29, %s648_s8  ;;  %p654_p7 = scmp.lt.s32.totalorder %s648_s8, %s648_s8 }
  0x14   :  { %p655_p8 = por %p654_p7, %p653_p6 }
  0x16   :  { %p656_p9 = pnand %p655_p8, %p649_p5 }
  0x18   :  { %659 = shalt.err (!%p656_p9)
}
  0x19   :  { %24 = dma.hbm_to_vmem [thread:$0]  %s872_s0, 128, %s22_s29, [#allocation3]  }
  0x1a   :  { %s668_s11 = scalar_lea.vmem %s43_s7, 2048  ;;  %p673_p11 = scmp.lt.s32.totalorder %s43_s7, %s43_s7 }
  0x1b   :  { %p669_p10 = scmp.ne.s32.totalorder %s43_s7, %s668_s11  ;;  %p674_p12 = scmp.lt.s32.totalorder %s668_s11, %s668_s11 }
  0x1d   :  { %p675_p13 = por %p674_p12, %p673_p11 }
  0x1f   :  { %p676_p0 = pnand %p675_p13, %p669_p10 }
  0x21   :  { %679 = shalt.err (!%p676_p0)
}
  0x22   :  { %48 = dma.hbm_to_vmem [thread:$0]  %s874_s2, 2048, %s43_s7, [#allocation6], %s729_s24, %s729_s24, %s730_s25  }
  0x23   :  { %s733_s13 = smov [#allocation8]  }
  0x24   :  { %s56_s14 = sshll.u32 %s733_s13, 4  ;;  %s57_s14 = int_to_ptr.vmem [resolvable:$true] %s56_s14 }
  0x25   :  { %s688_s15 = scalar_lea.vmem %s57_s14, 2048  ;;  %p693_p2 = scmp.lt.s32.totalorder %s57_s14, %s57_s14 }
  0x26   :  { %p689_p1 = scmp.ne.s32.totalorder %s57_s14, %s688_s15  ;;  %p694_p3 = scmp.lt.s32.totalorder %s688_s15, %s688_s15 }
  0x28   :  { %p695_p4 = por %p694_p3, %p693_p2 }
  0x2a   :  { %p696_p5 = pnand %p695_p4, %p689_p1 }
  0x2c   :  { %699 = shalt.err (!%p696_p5)
}
  0x2d   :  { %62 = dma.hbm_to_vmem [thread:$0]  %s876_s4, 2048, %s57_s14, [#allocation9], %s729_s24, %s729_s24, %s730_s25  }
  0x2e   :  { %720 = dma.done.wait [#allocation3], 128  }
  0x2f   :  { %721 = vsyncadd [#allocation3], 4294967168 }
  0x30   :  { %722 = dma.done.wait [#allocation6], 4096  }
  0x31   :  { %723 = vsyncadd [#allocation6], 4294963200 }
  0x32   :  { %724 = dma.done.wait [#allocation9], 2048  }
  0x33   :  { %725 = vsyncadd [#allocation9], 4294965248  ;;  %v734_v0 = vmov 2   ;;  %v735_v1 = vmov 0   ;;  %v736_v2 = vmov 0.0   ;;  %v77_v3 = vld [vmem:[#allocation2] sm:$0xff]  ;;  %v78_v40 = vlaneseq }
  0x34   :  { %613 = vset.pattern.permute.xlu1 %v734_v0  ;;  %611 = vset.pattern.permute.xlu0 %v735_v1  ;;  %v151_v4 = vld [vmem:[#allocation5 + $0x78] sm:$0xff]  ;;  %v150_v5 = vld [vmem:[#allocation5 + $0x70] sm:$0xff]  ;;  %v737_v6 = vmov 3   ;;  %v738_v7 = vmov 1   ;;  %v149_v8 = vld [vmem:[#allocation5 + $0x68] sm:$0xff]  ;;  %v739_v10 = vmov 4  }
  0x35   :  { %489 = vmatprep.subr.mxu0 %v736_v2  ;;  %524 = vmatprep.subr.mxu1 %v736_v2  ;;  %v148_v9 = vld [vmem:[#allocation5 + $0x60] sm:$0xff]  ;;  %v740_v11 = vmov 5   ;;  %v147_v12 = vld [vmem:[#allocation5 + $0x58] sm:$0xff]  ;;  %v146_v13 = vld [vmem:[#allocation5 + $0x50] sm:$0xff]  ;;  %v741_v14 = vmov 6   ;;  %v742_v17 = vmov 7  }
  0x36   :  { %95 = vperm.xlu1 %613, %v77_v3   ;;  %81 = vperm.xlu0 %611, %v77_v3   ;;  %v145_v15 = vld [vmem:[#allocation5 + $0x48] sm:$0xff]  ;;  %v144_v16 = vld [vmem:[#allocation5 + $0x40] sm:$0xff]  ;;  %v143_v18 = vld [vmem:[#allocation5 + $0x38] sm:$0xff]  ;;  %vm743_vm0 = vmmov 0   ;;  %v79_v43 = vand.u32 127, %v78_v40  ;;  %s744_s19 = smov [#allocation10]  }
  0x37   :  { %490 = vmatpush3.msra.mxu0 %v151_v4  ;;  %v142_v19 = vld [vmem:[#allocation5 + $0x30] sm:$0xff]  ;;  %v238_v20 = vld [vmem:[#allocation7 + $0x78] sm:$0xff]  ;;  %521 = vmatprep.mubr.msk.f32.mxu0 %vm743_vm0, %v736_v2  ;;  %v141_v22 = vld [vmem:[#allocation5 + $0x28] sm:$0xff]  ;;  %s417_s20 = sshll.u32 %s744_s19, 4  ;;  %s418_s20 = int_to_ptr.vmem [resolvable:$true] %s417_s20 }
  0x38   :  { %491 = vmatprep.subr.mxu0 %v736_v2  ;;  %v237_v21 = vld [vmem:[#allocation7 + $0x70] sm:$0xff]  ;;  %525 = vmatpush3.msra.mxu1 %v238_v20  ;;  %v236_v23 = vld [vmem:[#allocation7 + $0x68] sm:$0xff]  ;;  %v140_v24 = vld [vmem:[#allocation5 + $0x20] sm:$0xff]  ;;  %s700_s21 = scalar_lea.vmem %s418_s20, 128  ;;  %p705_p7 = scmp.lt.s32.totalorder %s418_s20, %s418_s20 }
  0x39   :  { %492 = vmatpush3.msra.mxu0 %v150_v5  ;;  %526 = vmatprep.subr.mxu1 %v736_v2  ;;  %v235_v25 = vld [vmem:[#allocation7 + $0x60] sm:$0xff]  ;;  %v139_v26 = vld [vmem:[#allocation5 + $0x18] sm:$0xff]  ;;  %v138_v28 = vld [vmem:[#allocation5 + $0x10] sm:$0xff]  ;;  %p701_p6 = scmp.ne.s32.totalorder %s418_s20, %s700_s21  ;;  %p706_p8 = scmp.lt.s32.totalorder %s700_s21, %s700_s21 }
  0x3a   :  { %614 = vset.pattern.permute.xlu1 %v737_v6  ;;  %612 = vset.pattern.permute.xlu0 %v738_v7  ;;  %v234_v27 = vld [vmem:[#allocation7 + $0x58] sm:$0xff]  ;;  %v233_v29 = vld [vmem:[#allocation7 + $0x50] sm:$0xff]  ;;  %v137_v30 = vld [vmem:[#allocation5 + $0x8] sm:$0xff] }
  0x3b   :  { %102 = vperm.xlu1 %614, %v77_v3   ;;  %88 = vperm.xlu0 %612, %v77_v3   ;;  %v232_v31 = vld [vmem:[#allocation7 + $0x48] sm:$0xff]  ;;  %v136_v32 = vld [vmem:[#allocation5] sm:$0xff]  ;;  %v230_v34 = vld [vmem:[#allocation7 + $0x38] sm:$0xff]  ;;  %p707_p9 = por %p706_p8, %p705_p7 }
  0x3c   :  { %493 = vmatprep.subr.mxu0 %v736_v2  ;;  %527 = vmatpush3.msra.mxu1 %v237_v21  ;;  %v231_v33 = vld [vmem:[#allocation7 + $0x40] sm:$0xff]  ;;  %v229_v35 = vld [vmem:[#allocation7 + $0x30] sm:$0xff]  ;;  %v228_v36 = vld [vmem:[#allocation7 + $0x28] sm:$0xff] }
  0x3d   :  { %494 = vmatpush3.msra.mxu0 %v149_v8  ;;  %528 = vmatprep.subr.mxu1 %v736_v2  ;;  %v227_v37 = vld [vmem:[#allocation7 + $0x20] sm:$0xff]  ;;  %v226_v38 = vld [vmem:[#allocation7 + $0x18] sm:$0xff]  ;;  %v225_v39 = vld [vmem:[#allocation7 + $0x10] sm:$0xff]  ;;  %p708_p10 = pnand %p707_p9, %p701_p6 }
  0x3e   :  { %495 = vmatprep.subr.mxu0 %v736_v2  ;;  %529 = vmatpush3.msra.mxu1 %v236_v23  ;;  %v224_v1 = vld [vmem:[#allocation7 + $0x8] sm:$0xff]  ;;  %v332_v4 = vld [vmem:[#allocation8 + $0x78] sm:$0xff]  ;;  %v331_v5 = vld [vmem:[#allocation8 + $0x70] sm:$0xff] }
  0x3f   :  { %615 = vset.pattern.permute.xlu1 %v739_v10  ;;  %616 = vset.pattern.permute.xlu0 %v740_v11  ;;  %v330_v6 = vld [vmem:[#allocation8 + $0x68] sm:$0xff]  ;;  %v329_v7 = vld [vmem:[#allocation8 + $0x60] sm:$0xff]  ;;  %v328_v8 = vld [vmem:[#allocation8 + $0x58] sm:$0xff] }
  0x40   :  { %109 = vperm.xlu1 %615, %v77_v3   ;;  %116 = vperm.xlu0 %616, %v77_v3   ;;  %v326_v10 = vld [vmem:[#allocation8 + $0x48] sm:$0xff]  ;;  %v325_v11 = vld [vmem:[#allocation8 + $0x40] sm:$0xff]  ;;  %v319_v20 = vld [vmem:[#allocation8 + $0x10] sm:$0xff] }
  0x41   :  { %496 = vmatpush3.msra.mxu0 %v148_v9  ;;  %530 = vmatprep.subr.mxu1 %v736_v2  ;;  %v327_v9 = vld [vmem:[#allocation8 + $0x50] sm:$0xff]  ;;  %v318_v21 = vld [vmem:[#allocation8 + $0x8] sm:$0xff]  ;;  %v436_v23 = vld [vmem:[%s875_s3] ss:$0 sm:$0xff] }
  0x42   :  { %497 = vmatprep.subr.mxu0 %v736_v2  ;;  %531 = vmatpush3.msra.mxu1 %v235_v25 }
  0x43   :  { %498 = vmatpush3.msra.mxu0 %v147_v12  ;;  %532 = vmatprep.subr.mxu1 %v736_v2  ;;  %v324_v12 = vld [vmem:[#allocation8 + $0x38] sm:$0xff] }
  0x44   :  { %617 = vset.pattern.permute.xlu1 %v741_v14  ;;  %499 = vmatprep.subr.mxu0 %v736_v2  ;;  %v322_v14 = vld [vmem:[#allocation8 + $0x28] sm:$0xff] }
  0x45   :  { %123 = vperm.xlu1 %617, %v77_v3   ;;  %500 = vmatpush3.msra.mxu0 %v146_v13  ;;  %v323_v13 = vld [vmem:[#allocation8 + $0x30] sm:$0xff] }
  0x46   :  { %501 = vmatprep.subr.mxu0 %v736_v2  ;;  %619 = vset.pattern.permute.xlu0 %v742_v17 }
  0x47   :  { %502 = vmatpush3.msra.mxu0 %v145_v15  ;;  %533 = vmatpush3.msra.mxu1 %v234_v27  ;;  %v321_v15 = vld [vmem:[#allocation8 + $0x20] sm:$0xff] }
  0x48   :  { %503 = vmatprep.subr.mxu0 %v736_v2  ;;  %534 = vmatprep.subr.mxu1 %v736_v2 }
  0x49   :  { %618 = vset.pattern.permute.xlu1 %v742_v17  ;;  %504 = vmatpush3.msra.mxu0 %v144_v16  ;;  %v320_v16 = vld [vmem:[#allocation8 + $0x18] sm:$0xff] }
  0x4a   :  { %130 = vperm.xlu1 %618, %v77_v3   ;;  %505 = vmatprep.subr.mxu0 %v736_v2  ;;  %v223_v3 = vld [vmem:[#allocation7] sm:$0xff] }
  0x4b   :  { %506 = vmatpush3.msra.mxu0 %v143_v18  ;;  %535 = vmatpush3.msra.mxu1 %v233_v29 }
  0x4c   :  { %507 = vmatprep.subr.mxu0 %v736_v2  ;;  %536 = vmatprep.subr.mxu1 %v736_v2 }
  0x4d   :  { %508 = vmatpush3.msra.mxu0 %v142_v19  ;;  %537 = vmatpush3.msra.mxu1 %v232_v31 }
  0x4e   :  { %509 = vmatprep.subr.mxu0 %v736_v2  ;;  %538 = vmatprep.subr.mxu1 %v736_v2 }
  0x4f   :  { %510 = vmatpush3.msra.mxu0 %v141_v22  ;;  %539 = vmatpush3.msra.mxu1 %v231_v33  ;;  %v317_v22 = vld [vmem:[#allocation8] sm:$0xff] }
  0x50   :  { %511 = vmatprep.subr.mxu0 %v736_v2  ;;  %556 = vmatprep.mubr.msk.f32.mxu1 %vm743_vm0, %v736_v2 }
  0x51   :  { %512 = vmatpush3.msra.mxu0 %v140_v24  ;;  %540 = vmatprep.subr.mxu1 %v736_v2 }
  0x52   :  { %513 = vmatprep.subr.mxu0 %v736_v2  ;;  %541 = vmatpush3.msra.mxu1 %v230_v34 }
  0x53   :  { %514 = vmatpush3.msra.mxu0 %v139_v26  ;;  %542 = vmatprep.subr.mxu1 %v736_v2 }
  0x54   :  { %515 = vmatprep.subr.mxu0 %v736_v2  ;;  %543 = vmatpush3.msra.mxu1 %v229_v35 }
  0x55   :  { %516 = vmatpush3.msra.mxu0 %v138_v28  ;;  %544 = vmatprep.subr.mxu1 %v736_v2  ;;  %v437_v28 = vld [vmem:[%s877_s5] ss:$0 sm:$0xff] }
  0x56   :  { %517 = vmatprep.subr.mxu0 %v736_v2  ;;  %545 = vmatpush3.msra.mxu1 %v228_v36 }
  0x57   :  { %518 = vmatpush3.msra.mxu0 %v137_v30  ;;  %546 = vmatprep.subr.mxu1 %v736_v2 }
  0x58   :  { %519 = vmatprep.subr.mxu0 %v736_v2  ;;  %547 = vmatpush3.msra.mxu1 %v227_v37 }
  0x59   :  { %520 = vmatpush3.msra.mxu0 %v136_v32  ;;  %548 = vmatprep.subr.mxu1 %v736_v2 }
  0x5a   :  { %559 = vmatprep.subr.mxu0 %v736_v2  ;;  %549 = vmatpush3.msra.mxu1 %v226_v38 }
  0x5b   :  { %550 = vmatprep.subr.mxu1 %v736_v2 }
  0x5c   :  { %551 = vmatpush3.msra.mxu1 %v225_v39 }
  0x5d   :  { %552 = vmatprep.subr.mxu1 %v736_v2 }
  0x5e   :  { %553 = vmatpush3.msra.mxu1 %v224_v1 }
  0x5f   :  { %554 = vmatprep.subr.mxu1 %v736_v2 }
  0x60   :  { %555 = vmatpush3.msra.mxu1 %v223_v3 }
  0xb1   :  { %v96_v41 = vpop.permute.xlu1 %95  ;;  %v82_v42 = vpop.permute.xlu0 %81 }
  0xb2   :  { %vm83_vm1 = vcmp.eq.s32.totalorder %v79_v43, %v82_v42  ;;  %vm97_vm2 = vcmp.eq.s32.totalorder %v79_v43, %v96_v41 }
  0xb3   :  { %v428_v46 = vsel %vm83_vm1, 1.0, %v736_v2  ;;  %v430_v49 = vsel %vm97_vm2, 1.0, %v736_v2 }
  0xb6   :  { %v103_v44 = vpop.permute.xlu1 %102  ;;  %v89_v45 = vpop.permute.xlu0 %88 }
  0xb7   :  { %vm90_vm3 = vcmp.eq.s32.totalorder %v79_v43, %v89_v45  ;;  %vm104_vm4 = vcmp.eq.s32.totalorder %v79_v43, %v103_v44 }
  0xb8   :  { %v429_v47 = vsel %vm90_vm3, 1.0, %v736_v2  ;;  %v431_v53 = vsel %vm104_vm4, 1.0, %v736_v2 }
  0xb9   :  { %v93_v48 = vadd.f32 %v429_v47, %v428_v46 }
  0xbb   :  { %v100_v50 = vadd.f32 %v430_v49, %v93_v48  ;;  %v110_v51 = vpop.permute.xlu1 %109  ;;  %v117_v52 = vpop.permute.xlu0 %116 }
  0xbc   :  { %vm111_vm5 = vcmp.eq.s32.totalorder %v79_v43, %v110_v51  ;;  %vm118_vm6 = vcmp.eq.s32.totalorder %v79_v43, %v117_v52 }
  0xbd   :  { %v107_v54 = vadd.f32 %v431_v53, %v100_v50  ;;  %v432_v55 = vsel %vm111_vm5, 1.0, %v736_v2  ;;  %v433_v57 = vsel %vm118_vm6, 1.0, %v736_v2 }
  0xbf   :  { %v114_v56 = vadd.f32 %v432_v55, %v107_v54 }
  0xc0   :  { %v124_v58 = vpop.permute.xlu1 %123 }
  0xc1   :  { %vm125_vm7 = vcmp.eq.s32.totalorder %v79_v43, %v124_v58  ;;  %v121_v59 = vadd.f32 %v433_v57, %v114_v56 }
  0xc2   :  { %v434_v60 = vsel %vm125_vm7, 1.0, %v736_v2 }
  0xc3   :  { %v128_v62 = vadd.f32 %v434_v60, %v121_v59 }
  0xc5   :  { %v131_v61 = vpop.permute.xlu1 %130 }
  0xc6   :  { %vm132_vm8 = vcmp.eq.s32.totalorder %v79_v43, %v131_v61 }
  0xc7   :  { %v435_v63 = vsel %vm132_vm8, 1.0, %v736_v2 }
  0xc8   :  { %v135_v0 = vadd.f32 %v435_v63, %v128_v62 }
  0xca   :  { %522 = vmatmul.mubr.f32.vlgmr.msra.gmra.mxu0 %v135_v0 }
  0xcb   :  { %591 = vmatprep.mubr.msk.f32.mxu0 %vm743_vm0, %v736_v2  ;;  %560 = vmatpush3.msra.mxu0 %v332_v4 }
  0xcc   :  { %561 = vmatprep.subr.mxu0 %v736_v2 }
  0xcd   :  { %562 = vmatpush3.msra.mxu0 %v331_v5 }
  0xce   :  { %563 = vmatprep.subr.mxu0 %v736_v2 }
  0xcf   :  { %564 = vmatpush3.msra.mxu0 %v330_v6 }
  0xd0   :  { %565 = vmatprep.subr.mxu0 %v736_v2 }
  0xd1   :  { %566 = vmatpush3.msra.mxu0 %v329_v7 }
  0xd2   :  { %567 = vmatprep.subr.mxu0 %v736_v2 }
  0xd3   :  { %568 = vmatpush3.msra.mxu0 %v328_v8 }
  0xd4   :  { %569 = vmatprep.subr.mxu0 %v736_v2 }
  0xd5   :  { %570 = vmatpush3.msra.mxu0 %v327_v9 }
  0xd6   :  { %571 = vmatprep.subr.mxu0 %v736_v2 }
  0xd7   :  { %572 = vmatpush3.msra.mxu0 %v326_v10 }
  0xd8   :  { %573 = vmatprep.subr.mxu0 %v736_v2 }
  0xd9   :  { %574 = vmatpush3.msra.mxu0 %v325_v11 }
  0xda   :  { %575 = vmatprep.subr.mxu0 %v736_v2 }
  0xdb   :  { %576 = vmatpush3.msra.mxu0 %v324_v12 }
  0xdc   :  { %577 = vmatprep.subr.mxu0 %v736_v2 }
  0xdd   :  { %578 = vmatpush3.msra.mxu0 %v323_v13 }
  0xde   :  { %579 = vmatprep.subr.mxu0 %v736_v2 }
  0xdf   :  { %580 = vmatpush3.msra.mxu0 %v322_v14 }
  0xe0   :  { %581 = vmatprep.subr.mxu0 %v736_v2 }
  0xe1   :  { %582 = vmatpush3.msra.mxu0 %v321_v15 }
  0xe2   :  { %583 = vmatprep.subr.mxu0 %v736_v2 }
  0xe3   :  { %584 = vmatpush3.msra.mxu0 %v320_v16 }
  0xe4   :  { %585 = vmatprep.subr.mxu0 %v736_v2 }
  0xe5   :  { %586 = vmatpush3.msra.mxu0 %v319_v20 }
  0xe6   :  { %587 = vmatprep.subr.mxu0 %v736_v2 }
  0xe7   :  { %588 = vmatpush3.msra.mxu0 %v318_v21 }
  0xe8   :  { %589 = vmatprep.subr.mxu0 %v736_v2 }
  0xe9   :  { %590 = vmatpush3.msra.mxu0 %v317_v22 }
 0x18a   :  { %v218_v17 = vpop.f32.mrf.mxu0 }
 0x18b   :  { %v222_v18 = vmul.f32 0.125, %v218_v17 }
 0x18c   :  { %v523_v19 = vpop.f32.mrf.mxu0 }
 0x18d   :  { %557 = vmatmul.mubr.f32.vlgmr.msra.gmra.mxu1 %v222_v18 }
 0x24d   :  { %v312_v24 = vpop.f32.mrf.mxu1 }
 0x24e   :  { %v313_v25 = vadd.f32 %v436_v23, %v312_v24 }
 0x24f   :  { %v558_v26 = vpop.f32.mrf.mxu1 }
 0x250   :  { %v316_v27 = vmax.f32 %v313_v25, 0.0 }
 0x252   :  { %592 = vmatmul.mubr.f32.vlgmr.msra.gmra.mxu0 %v316_v27 }
 0x312   :  { %v406_v29 = vpop.f32.mrf.mxu0 }
 0x313   :  { %v407_v30 = vadd.f32 %v437_v28, %v406_v29 }
 0x314   :  { %v593_v2 = vpop.f32.mrf.mxu0 }
 0x315   :  { %410 = vst [vmem:[#allocation10] sm:$0xff] %v407_v30 }
 0x316   :  { %711 = shalt.err (!%p708_p10)
}
 0x317   :  { %420 = dma.vmem_to_hbm [thread:$0]  %s418_s20, 128, %s878_s6, [#allocation4]  }
 0x318   :  { %726 = dma.done.wait [#allocation4], 128  }
 0x319   :  { %727 = vsyncadd [#allocation4], 4294967168 }
 0x31a   :  { %424 = vsyncpa [#allocation3], 1 }
 0x31b   :  { %425 = vsyncpa [#allocation6], 1 }
 0x31c   :  { %426 = vsyncpa [#allocation9], 1 }
 0x31d   :  { %427 = vsyncpa [#allocation4], 1 }

</bundles_post_ra>
